<compile_context>
chip_gen: v5e
topology: v5e:2x2
jax: 0.10.0
libtpu: 0.0.40
codegen_flags: <defaults>
</compile_context>

<pallas_src>
import functools

import jax
import jax.numpy as jnp
from jax.experimental import pallas as pl
from jax.experimental.pallas import tpu as pltpu

_LANE = 128


def _mlp_kernel(x_ref,
                w1_ref, b1_ref,
                w2_ref, b2_ref,
                w3_ref, b3_ref,
                w4_ref, b4_ref,
                o_ref):
    out_dim = o_ref.shape[-1]
    # x arrives f32; cast to bf16 in-kernel (VPU pack, effectively free) so the
    # wrapper never materializes an extra HBM pass over x.
    x = x_ref[...].astype(jnp.bfloat16)

    # Layer 1: Linear + ReLU  (Dropout -> identity at inference)
    h = jnp.dot(x, w1_ref[...], preferred_element_type=jnp.float32)
    h = jnp.maximum(h + b1_ref[...], 0.0)
    # Layer 2: Linear + ReLU   (bf16 operands, f32 accumulation)
    h = jnp.dot(h.astype(jnp.bfloat16), w2_ref[...],
                preferred_element_type=jnp.float32)
    h = jnp.maximum(h + b2_ref[...], 0.0)
    # Layer 3: Linear + ReLU.  w3/b3 zero-padded 64->128: pad lanes stay 0.
    h = jnp.dot(h.astype(jnp.bfloat16), w3_ref[...],
                preferred_element_type=jnp.float32)
    h = jnp.maximum(h + b3_ref[...], 0.0)
    # Layer 4: Linear + Sigmoid.  w4 zero-padded to (128,128) for the MXU; the
    # pad output lanes are sliced off (static slice) BEFORE the store, so only
    # out_dim columns ever hit HBM.
    z = jnp.dot(h.astype(jnp.bfloat16), w4_ref[...],
                preferred_element_type=jnp.float32)
    z = z[:, :out_dim] + b4_ref[...]
    o_ref[...] = jax.nn.sigmoid(z).astype(o_ref.dtype)


def _round_up(v, m):
    return ((v + m - 1) // m) * m


@functools.partial(jax.jit, static_argnames=("block_b",))
def _feed_forward_impl(x, params, *, block_b):
    B, in_dim = x.shape
    h1 = params["w1"].shape[1]
    h2 = params["w2"].shape[1]
    h3 = params["w3"].shape[1]
    out_dim = params["w4"].shape[1]
    h3p = _round_up(h3, _LANE)       # 64 -> 128 for full-lane layout
    out_pad = _round_up(out_dim, _LANE)

    # bf16 weight operands for the MXU; biases stay f32 (post-accumulation).
    # These converts/pads are a few hundred KB total — negligible vs x traffic.
    w1 = params["w1"].astype(jnp.bfloat16)
    w2 = params["w2"].astype(jnp.bfloat16)
    w3 = params["w3"].astype(jnp.bfloat16)
    w4 = params["w4"].astype(jnp.bfloat16)
    b1 = params["b1"].astype(jnp.float32)
    b2 = params["b2"].astype(jnp.float32)
    b3 = params["b3"].astype(jnp.float32)
    b4 = params["b4"].astype(jnp.float32)
    # Zero-pad the 64-wide hidden layer and the final weight for the MXU only;
    # the HBM output stays (B, out_dim).
    if h3p != h3:
        w3 = jnp.pad(w3, ((0, 0), (0, h3p - h3)))
        b3 = jnp.pad(b3, ((0, 0), (0, h3p - h3)))
        w4 = jnp.pad(w4, ((0, h3p - h3), (0, 0)))
    if out_pad != out_dim:
        w4 = jnp.pad(w4, ((0, 0), (0, out_pad - out_dim)))

    # Batch tile: as big as block_b allows, but keep >= 2 grid steps so v7x's
    # two TensorCores both get work (grid axis is 'parallel').
    half_b = _round_up(max(pl.cdiv(B, 2), 1), 8)
    block_eff = max(8, min(_round_up(block_b, 8), half_b))
    grid = (pl.cdiv(B, block_eff),)

    def bcast(shape):
        # Constant index_map: same whole weight/bias block every batch tile.
        return pl.BlockSpec(shape, lambda i: (0, 0))

    # VMEM budget from the real footprint (double-buffered x/out tiles,
    # weights, f32 intermediates), 2x headroom, no 32 MiB floor.
    vmem_est = (
        2 * block_eff * in_dim * 4                                     # x (f32)
        + 2 * block_eff * out_dim * 4                                  # out (f32)
        + 2 * (in_dim * h1 + h1 * h2 + h2 * h3p + h3p * out_pad) * 2   # weights
        + 2 * (h1 + h2 + h3p + out_dim) * 4                            # biases
        + 2 * block_eff * (h1 + h2 + h3p) * 4                          # activations
    )
    vmem_limit = int(min(max(2 * vmem_est, 8 << 20), 24 << 20))

    flops = 2 * B * (in_dim * h1 + h1 * h2 + h2 * h3 + h3 * out_dim)
    bytes_accessed = (
        B * in_dim * 4 + B * out_dim * 4
        + (in_dim * h1 + h1 * h2 + h2 * h3p + h3p * out_pad) * 2
        + (h1 + h2 + h3p + out_dim) * 4
    )
    cost = pl.CostEstimate(flops=flops,
                           transcendentals=B * out_dim,
                           bytes_accessed=bytes_accessed)

    return pl.pallas_call(
        _mlp_kernel,
        out_shape=jax.ShapeDtypeStruct((B, out_dim), jnp.float32),
        grid_spec=pltpu.PrefetchScalarGridSpec(
            num_scalar_prefetch=0,
            grid=grid,
            in_specs=[
                pl.BlockSpec((block_eff, in_dim), lambda i: (i, 0)),   # x tile
                bcast((in_dim, h1)),  bcast((1, h1)),
                bcast((h1, h2)),      bcast((1, h2)),
                bcast((h2, h3p)),     bcast((1, h3p)),
                bcast((h3p, out_pad)), bcast((1, out_dim)),
            ],
            out_specs=pl.BlockSpec((block_eff, out_dim), lambda i: (i, 0)),
        ),
        compiler_params=pltpu.CompilerParams(
            dimension_semantics=("parallel",),
            vmem_limit_bytes=vmem_limit),
        cost_estimate=cost,
    )(x, w1, b1, w2, b2, w3, b3, w4, b4)


def feed_forward(x, params, *, block_b=2048):
    """Fused MLP forward pass (inference).

    x: [B, input_dim] float32
    params: dict with w1,b1,...,w4,b4 (weights [in,out], biases [1,out])
    returns: [B, output_dim] float32
    """
    return _feed_forward_impl(x, params, block_b=block_b)


def init_params(key, input_dim, output_dim):
    """Deterministic init mimicking torch.nn.Linear default U[-1/sqrt(fan_in), 1/sqrt(fan_in)]."""
    dims = [input_dim, 256, 128, 64, output_dim]
    params = {}
    for li, (fan_in, fan_out) in enumerate(zip(dims[:-1], dims[1:]), start=1):
        key, kw, kb = jax.random.split(key, 3)
        bound = 1.0 / jnp.sqrt(fan_in)
        params[f"w{li}"] = jax.random.uniform(
            kw, (fan_in, fan_out), jnp.float32, -bound, bound)
        params[f"b{li}"] = jax.random.uniform(
            kb, (1, fan_out), jnp.float32, -bound, bound)
    return params


def _reference(x, p):
    # Mirrors the kernel math (bf16 operands, f32 accumulation) for tight check.
    bf = jnp.bfloat16
    h = jnp.dot(x.astype(bf), p["w1"].astype(bf),
                preferred_element_type=jnp.float32)
    h = jnp.maximum(h + p["b1"], 0.0)
    h = jnp.dot(h.astype(bf), p["w2"].astype(bf),
                preferred_element_type=jnp.float32)
    h = jnp.maximum(h + p["b2"], 0.0)
    h = jnp.dot(h.astype(bf), p["w3"].astype(bf),
                preferred_element_type=jnp.float32)
    h = jnp.maximum(h + p["b3"], 0.0)
    z = jnp.dot(h.astype(bf), p["w4"].astype(bf),
                preferred_element_type=jnp.float32) + p["b4"]
    return jax.nn.sigmoid(z)


if __name__ == "__main__":
    key = jax.random.PRNGKey(0)
    batch, input_dim, output_dim = 256, 32, 8

    key, kx, kp = jax.random.split(key, 3)
    x = jax.random.normal(kx, (batch, input_dim), jnp.float32)
    params = init_params(kp, input_dim, output_dim)

    # With batch=256 the tile cap (ceil(B/2) rounded to 8 -> 128) yields a
    # 2-step 'parallel' grid, so both v7x TensorCores get work.
    out = feed_forward(x, params)
    out = jax.block_until_ready(out)

    ref = _reference(x, params)
    assert out.shape == (batch, output_dim)
    assert jnp.allclose(out, ref, atol=2e-3, rtol=2e-3), "mismatch vs reference"

    print("KERNEL_OK")
</pallas_src>

<mosaic_0001>
module attributes {stable_mosaic.version = 11 : i64} {
  func.func @_mlp_kernel(%arg0: i32, %arg1: memref<128x32xf32, #tpu.memory_space<vmem>>, %arg2: memref<32x256xbf16, #tpu.memory_space<vmem>>, %arg3: memref<1x256xf32, #tpu.memory_space<vmem>>, %arg4: memref<256x128xbf16, #tpu.memory_space<vmem>>, %arg5: memref<1x128xf32, #tpu.memory_space<vmem>>, %arg6: memref<128x128xbf16, #tpu.memory_space<vmem>>, %arg7: memref<1x128xf32, #tpu.memory_space<vmem>>, %arg8: memref<128x128xbf16, #tpu.memory_space<vmem>>, %arg9: memref<1x8xf32, #tpu.memory_space<vmem>>, %arg10: memref<128x8xf32, #tpu.memory_space<vmem>>) attributes {dimension_semantics = [#tpu.dimension_semantics<parallel>], iteration_bounds = array<i64: 2>, scalar_prefetch = 0 : i64, scratch_operands = 0 : i64, tpu.core_type = #tpu.core_type<tc>, window_params = [{transform_indices = @transform_0, window_bounds = array<i64: 128, 32>}, {pipeline_mode = #tpu.pipeline_mode<synchronous>, transform_indices = @transform_1, window_bounds = array<i64: 32, 256>}, {pipeline_mode = #tpu.pipeline_mode<synchronous>, transform_indices = @transform_2, window_bounds = array<i64: 1, 256>}, {pipeline_mode = #tpu.pipeline_mode<synchronous>, transform_indices = @transform_3, window_bounds = array<i64: 256, 128>}, {pipeline_mode = #tpu.pipeline_mode<synchronous>, transform_indices = @transform_4, window_bounds = array<i64: 1, 128>}, {pipeline_mode = #tpu.pipeline_mode<synchronous>, transform_indices = @transform_5, window_bounds = array<i64: 128, 128>}, {pipeline_mode = #tpu.pipeline_mode<synchronous>, transform_indices = @transform_6, window_bounds = array<i64: 1, 128>}, {pipeline_mode = #tpu.pipeline_mode<synchronous>, transform_indices = @transform_7, window_bounds = array<i64: 128, 128>}, {pipeline_mode = #tpu.pipeline_mode<synchronous>, transform_indices = @transform_8, window_bounds = array<i64: 1, 8>}, {transform_indices = @transform_9, window_bounds = array<i64: 128, 8>}]} {
    %c0 = arith.constant 0 : index
    %c0_0 = arith.constant 0 : index
    %0 = vector.load %arg1[%c0, %c0_0] : memref<128x32xf32, #tpu.memory_space<vmem>>, vector<128x32xf32>
    %1 = arith.truncf %0 : vector<128x32xf32> to vector<128x32xbf16>
    %c0_1 = arith.constant 0 : index
    %c0_2 = arith.constant 0 : index
    %2 = vector.load %arg2[%c0_1, %c0_2] : memref<32x256xbf16, #tpu.memory_space<vmem>>, vector<32x256xbf16>
    %cst = arith.constant dense<0.000000e+00> : vector<128x256xf32>
    %3 = tpu.matmul %1, %2, %cst {dimension_numbers = #tpu.dot_dimension_numbers<[1], [0], [0], [1], [0, 0, 1, 1], [], []>} : vector<128x32xbf16>, vector<32x256xbf16>, vector<128x256xf32> -> vector<128x256xf32>
    %c0_3 = arith.constant 0 : index
    %c0_4 = arith.constant 0 : index
    %4 = vector.load %arg3[%c0_3, %c0_4] : memref<1x256xf32, #tpu.memory_space<vmem>>, vector<1x256xf32>
    %5 = vector.broadcast %4 : vector<1x256xf32> to vector<128x256xf32>
    %6 = arith.addf %3, %5 : vector<128x256xf32>
    %cst_5 = arith.constant 0.000000e+00 : f32
    %7 = vector.broadcast %cst_5 : f32 to vector<128x256xf32>
    %8 = arith.maximumf %6, %7 : vector<128x256xf32>
    %9 = arith.truncf %8 : vector<128x256xf32> to vector<128x256xbf16>
    %c0_6 = arith.constant 0 : index
    %c0_7 = arith.constant 0 : index
    %10 = vector.load %arg4[%c0_6, %c0_7] : memref<256x128xbf16, #tpu.memory_space<vmem>>, vector<256x128xbf16>
    %cst_8 = arith.constant dense<0.000000e+00> : vector<128x128xf32>
    %11 = tpu.matmul %9, %10, %cst_8 {dimension_numbers = #tpu.dot_dimension_numbers<[1], [0], [0], [1], [0, 0, 1, 1], [], []>} : vector<128x256xbf16>, vector<256x128xbf16>, vector<128x128xf32> -> vector<128x128xf32>
    %c0_9 = arith.constant 0 : index
    %c0_10 = arith.constant 0 : index
    %12 = vector.load %arg5[%c0_9, %c0_10] : memref<1x128xf32, #tpu.memory_space<vmem>>, vector<1x128xf32>
    %13 = vector.broadcast %12 : vector<1x128xf32> to vector<128x128xf32>
    %14 = arith.addf %11, %13 : vector<128x128xf32>
    %cst_11 = arith.constant 0.000000e+00 : f32
    %15 = vector.broadcast %cst_11 : f32 to vector<128x128xf32>
    %16 = arith.maximumf %14, %15 : vector<128x128xf32>
    %17 = arith.truncf %16 : vector<128x128xf32> to vector<128x128xbf16>
    %c0_12 = arith.constant 0 : index
    %c0_13 = arith.constant 0 : index
    %18 = vector.load %arg6[%c0_12, %c0_13] : memref<128x128xbf16, #tpu.memory_space<vmem>>, vector<128x128xbf16>
    %cst_14 = arith.constant dense<0.000000e+00> : vector<128x128xf32>
    %19 = tpu.matmul %17, %18, %cst_14 {dimension_numbers = #tpu.dot_dimension_numbers<[1], [0], [0], [1], [0, 0, 1, 1], [], []>} : vector<128x128xbf16>, vector<128x128xbf16>, vector<128x128xf32> -> vector<128x128xf32>
    %c0_15 = arith.constant 0 : index
    %c0_16 = arith.constant 0 : index
    %20 = vector.load %arg7[%c0_15, %c0_16] : memref<1x128xf32, #tpu.memory_space<vmem>>, vector<1x128xf32>
    %21 = vector.broadcast %20 : vector<1x128xf32> to vector<128x128xf32>
    %22 = arith.addf %19, %21 : vector<128x128xf32>
    %cst_17 = arith.constant 0.000000e+00 : f32
    %23 = vector.broadcast %cst_17 : f32 to vector<128x128xf32>
    %24 = arith.maximumf %22, %23 : vector<128x128xf32>
    %25 = arith.truncf %24 : vector<128x128xf32> to vector<128x128xbf16>
    %c0_18 = arith.constant 0 : index
    %c0_19 = arith.constant 0 : index
    %26 = vector.load %arg8[%c0_18, %c0_19] : memref<128x128xbf16, #tpu.memory_space<vmem>>, vector<128x128xbf16>
    %cst_20 = arith.constant dense<0.000000e+00> : vector<128x128xf32>
    %27 = tpu.matmul %25, %26, %cst_20 {dimension_numbers = #tpu.dot_dimension_numbers<[1], [0], [0], [1], [0, 0, 1, 1], [], []>} : vector<128x128xbf16>, vector<128x128xbf16>, vector<128x128xf32> -> vector<128x128xf32>
    %28 = vector.extract_strided_slice %27 {offsets = [0, 0], sizes = [128, 8], strides = [1, 1]} : vector<128x128xf32> to vector<128x8xf32>
    %c0_21 = arith.constant 0 : index
    %c0_22 = arith.constant 0 : index
    %29 = vector.load %arg9[%c0_21, %c0_22] : memref<1x8xf32, #tpu.memory_space<vmem>>, vector<1x8xf32>
    %30 = vector.broadcast %29 : vector<1x8xf32> to vector<128x8xf32>
    %31 = arith.addf %28, %30 : vector<128x8xf32>
    %32 = arith.negf %31 : vector<128x8xf32>
    %33 = math.exp %32 : vector<128x8xf32>
    %cst_23 = arith.constant 1.000000e+00 : f32
    %34 = vector.broadcast %cst_23 : f32 to vector<128x8xf32>
    %35 = arith.addf %34, %33 : vector<128x8xf32>
    %36 = arith.divf %34, %35 : vector<128x8xf32>
    %c0_24 = arith.constant 0 : index
    %c0_25 = arith.constant 0 : index
    %37 = vector.load %arg10[%c0_24, %c0_25] : memref<128x8xf32, #tpu.memory_space<vmem>>, vector<128x8xf32>
    tpu.vector_store %arg10[%c0_24, %c0_25], %36 {strides = array<i32>} : memref<128x8xf32, #tpu.memory_space<vmem>>, vector<128x8xf32>,
    return
  }
  func.func @transform_0(%arg0: i32) -> (i32, i32) {
    %c0_i32 = arith.constant 0 : i32
    %c0_i32_0 = arith.constant 0 : i32
    return %arg0, %c0_i32 : i32, i32
  }
  func.func @transform_1(%arg0: i32) -> (i32, i32) {
    %c0_i32 = arith.constant 0 : i32
    %c0_i32_0 = arith.constant 0 : i32
    %c0_i32_1 = arith.constant 0 : i32
    return %c0_i32, %c0_i32_0 : i32, i32
  }
  func.func @transform_2(%arg0: i32) -> (i32, i32) {
    %c0_i32 = arith.constant 0 : i32
    %c0_i32_0 = arith.constant 0 : i32
    %c0_i32_1 = arith.constant 0 : i32
    return %c0_i32, %c0_i32_0 : i32, i32
  }
  func.func @transform_3(%arg0: i32) -> (i32, i32) {
    %c0_i32 = arith.constant 0 : i32
    %c0_i32_0 = arith.constant 0 : i32
    %c0_i32_1 = arith.constant 0 : i32
    return %c0_i32, %c0_i32_0 : i32, i32
  }
  func.func @transform_4(%arg0: i32) -> (i32, i32) {
    %c0_i32 = arith.constant 0 : i32
    %c0_i32_0 = arith.constant 0 : i32
    %c0_i32_1 = arith.constant 0 : i32
    return %c0_i32, %c0_i32_0 : i32, i32
  }
  func.func @transform_5(%arg0: i32) -> (i32, i32) {
    %c0_i32 = arith.constant 0 : i32
    %c0_i32_0 = arith.constant 0 : i32
    %c0_i32_1 = arith.constant 0 : i32
    return %c0_i32, %c0_i32_0 : i32, i32
  }
  func.func @transform_6(%arg0: i32) -> (i32, i32) {
    %c0_i32 = arith.constant 0 : i32
    %c0_i32_0 = arith.constant 0 : i32
    %c0_i32_1 = arith.constant 0 : i32
    return %c0_i32, %c0_i32_0 : i32, i32
  }
  func.func @transform_7(%arg0: i32) -> (i32, i32) {
    %c0_i32 = arith.constant 0 : i32
    %c0_i32_0 = arith.constant 0 : i32
    %c0_i32_1 = arith.constant 0 : i32
    return %c0_i32, %c0_i32_0 : i32, i32
  }
  func.func @transform_8(%arg0: i32) -> (i32, i32) {
    %c0_i32 = arith.constant 0 : i32
    %c0_i32_0 = arith.constant 0 : i32
    %c0_i32_1 = arith.constant 0 : i32
    return %c0_i32, %c0_i32_0 : i32, i32
  }
  func.func @transform_9(%arg0: i32) -> (i32, i32) {
    %c0_i32 = arith.constant 0 : i32
    %c0_i32_0 = arith.constant 0 : i32
    return %arg0, %c0_i32 : i32, i32
  }
}

</mosaic_0001>

<bundles_post_ra>
// kernel: _feed_forward_impl.1
= control target key start
LH: loop header
LB: loop body
LE: loop exit
PB: predicated region body
PF: predicated region fallthrough
CT: control target
= control target key end

     0   :  { %s1835_s30 = smov 0   ;;  %s2131_s0 = inlined_call_operand.vmem [shape: f32[256,32], index: 0, kind: input, shape index: {}]   ;;  %s2132_s1 = inlined_call_operand.vmem [shape: bf16[32,256], index: 1, kind: input, shape index: {}]   ;;  %s2133_s2 = inlined_call_operand.vmem [shape: f32[1,256], index: 2, kind: input, shape index: {}]   ;;  %s2134_s3 = inlined_call_operand.vmem [shape: bf16[256,128], index: 3, kind: input, shape index: {}]   ;;  %s2135_s4 = inlined_call_operand.vmem [shape: f32[1,128], index: 4, kind: input, shape index: {}]   ;;  %s2136_s5 = inlined_call_operand.vmem [shape: bf16[128,128], index: 5, kind: input, shape index: {}]   ;;  %s2137_s6 = inlined_call_operand.vmem [shape: f32[1,128], index: 6, kind: input, shape index: {}]   ;;  %s2138_s7 = inlined_call_operand.vmem [shape: bf16[128,128], index: 7, kind: input, shape index: {}]   ;;  %s2139_s8 = inlined_call_operand.vmem [shape: f32[1,8], index: 8, kind: input, shape index: {}]   ;;  %s2140_s9 = inlined_call_operand.vmem [shape: f32[256,8], index: 9, kind: output, shape index: {}]  }
   0x1 LB: > { %s1467_s10 = sadd.s32 4294967295, %s1783_s30   ;;  %p1471_p0 = scmp.ge.s32.totalorder %s1783_s30, 1  ;;  %s1783_s30 = sphi %s1835_s30, %s19_s30  }
   0x2   : > { %p288_p1 = scmp.lt.s32.totalorder %s1783_s30, 3 }
   0x4   : > { %p289_p2 = pnand %p1471_p0, %p288_p1 }
   0x5   : > { %s1472_s27 = sshll.u32 (!%p289_p2), %s1467_s10, 4 }
   0x6   : > { %292 = sbr.rel (%p289_p2) target bundleno = 732 (0x2dc), region = 56  ;;  %p325_p3 = scmp.lt.s32.totalorder (!%p289_p2), %s1472_s27, 31 }
   0xb   : > { %v1486_v0 = vld [vmem:[%s2132_s1 + $0x10] sm:$0xf]  ;;  %v1657_v1 = vld [vmem:[%s2132_s1 + $0x14] sm:$0xf0]  ;;  %v1656_v2 = vld [vmem:[%s2132_s1 + $0x14] sm:$0xf] }
   0xc   : > { %v1487_v3 = vor.u32 %v1657_v1, %v1486_v0  ;;  %v1488_v4 = vld [vmem:[%s2132_s1 + $0x18] sm:$0xf0]  ;;  %v1478_v5 = vld [vmem:[%s2132_s1] sm:$0xf]  ;;  %v1655_v6 = vld [vmem:[%s2132_s1 + $0x4] sm:$0xf0] }
   0xd   : > { %v1491_v7 = vor.u32 %v1656_v2, %v1488_v4  ;;  %v1654_v8 = vld [vmem:[%s2132_s1 + $0x4] sm:$0xf]  ;;  %v1480_v9 = vld [vmem:[%s2132_s1 + $0x8] sm:$0xf0]  ;;  %v1479_v10 = vor.u32 %v1655_v6, %v1478_v5  ;;  %s2142_s27 = smov (!%p325_p3, %s1472_s27), 31  ;;  %vm391_vm0 = vcmask 261120  }
   0xe   : > { %422 = vmatpush.bf16.msra.mxu0 %v1487_v3  ;;  %1690 = vmatpush.bf16.msra.mxu2 %v1487_v3  ;;  %v1483_v11 = vor.u32 %v1654_v8, %v1480_v9  ;;  %s1473_s28 = sshll.u32 %s2142_s27, 3  ;;  %v1673_v27 = vld [vmem:[%s2134_s3 + $0x78] sm:$0xff]  ;;  %v1672_v29 = vld [vmem:[%s2134_s3 + $0x70] sm:$0xff]  ;;  %v1671_v31 = vld [vmem:[%s2134_s3 + $0x68] sm:$0xff]  ;;  %vm1394_vm4 = vcmask 64512  }
   0xf   : > { %471 = vmatpush.bf16.msra.mxu1 %v1491_v7  ;;  %1692 = vmatpush.bf16.msra.mxu3 %v1491_v7  ;;  %s1875_s10 = scalar_lea.vmem %s2131_s0, %s1473_s28  ;;  %v1665_v28 = vld [vmem:[%s2134_s3 + $0x38] sm:$0xff]  ;;  %v1664_v30 = vld [vmem:[%s2134_s3 + $0x30] sm:$0xff]  ;;  %v1663_v32 = vld [vmem:[%s2134_s3 + $0x28] sm:$0xff]  ;;  %s2082_s15 = scalar_lea.vmem %s2140_s9, %s1473_s28 }
  0x10   : > { %v337_v12 = vld [vmem:[%s1875_s10] sm:$0xff]  ;;  %v338_v13 = vld [vmem:[%s1875_s10 + $0x8] sm:$0xff]  ;;  %v339_v15 = vld [vmem:[%s1875_s10 + $0x10] sm:$0xff] }
  0x11   : > { %v353_v14 = vpack.c.bf16 %v338_v13, %v337_v12  ;;  %v340_v16 = vld [vmem:[%s1875_s10 + $0x18] sm:$0xff]  ;;  %v345_v18 = vld [vmem:[%s1875_s10 + $0x40] sm:$0xff]  ;;  %v346_v19 = vld [vmem:[%s1875_s10 + $0x48] sm:$0xff] }
  0x12   : > { %423 = vmatpush.bf16.msra.mxu0 %v1479_v10  ;;  %1691 = vmatpush.bf16.msra.mxu2 %v1479_v10  ;;  %v354_v17 = vpack.c.bf16 %v340_v16, %v339_v15  ;;  %v357_v20 = vpack.c.bf16 %v346_v19, %v345_v18  ;;  %v341_v21 = vld [vmem:[%s1875_s10 + $0x20] sm:$0xff]  ;;  %v342_v22 = vld [vmem:[%s1875_s10 + $0x28] sm:$0xff]  ;;  %v347_v24 = vld [vmem:[%s1875_s10 + $0x50] sm:$0xff] }
  0x13   : > { %472 = vmatpush.bf16.msra.mxu1 %v1483_v11  ;;  %1693 = vmatpush.bf16.msra.mxu3 %v1483_v11  ;;  %v355_v23 = vpack.c.bf16 %v342_v22, %v341_v21  ;;  %v348_v25 = vld [vmem:[%s1875_s10 + $0x58] sm:$0xff]  ;;  %v343_v33 = vld [vmem:[%s1875_s10 + $0x30] sm:$0xff]  ;;  %v1670_v35 = vld [vmem:[%s2134_s3 + $0x60] sm:$0xff] }
  0x14   : > { %v358_v26 = vpack.c.bf16 %v348_v25, %v347_v24  ;;  %v344_v34 = vld [vmem:[%s1875_s10 + $0x38] sm:$0xff]  ;;  %v349_v36 = vld [vmem:[%s1875_s10 + $0x60] sm:$0xff]  ;;  %v350_v37 = vld [vmem:[%s1875_s10 + $0x68] sm:$0xff] }
  0x15   : > { %1492 = vmatmul.msk.bf16.vlgmr.msra.gmra.mxu0 %vm391_vm0, %v353_v14  ;;  %v1662_v38 = vld [vmem:[%s2134_s3 + $0x20] sm:$0xff]  ;;  %v356_v39 = vpack.c.bf16 %v344_v34, %v343_v33  ;;  %v359_v40 = vpack.c.bf16 %v350_v37, %v349_v36  ;;  %v1669_v41 = vld [vmem:[%s2134_s3 + $0x58] sm:$0xff]  ;;  %v1668_v43 = vld [vmem:[%s2134_s3 + $0x50] sm:$0xff] }
  0x16   : > { %1500 = vmatmul.msk.bf16.vlgmr.msra.gmra.mxu1 %vm391_vm0, %v353_v14  ;;  %1504 = vmatmul.msk.bf16.vlgmr.msra.gmra.mxu3 %vm391_vm0, %v357_v20  ;;  %v1661_v42 = vld [vmem:[%s2134_s3 + $0x18] sm:$0xff]  ;;  %v1660_v44 = vld [vmem:[%s2134_s3 + $0x10] sm:$0xff]  ;;  %v1667_v48 = vld [vmem:[%s2134_s3 + $0x48] sm:$0xff] }
  0x17   : > { %1497 = vmatmul.msk.bf16.vlgmr.msra.gmra.mxu2 %vm391_vm0, %v358_v26  ;;  %743 = vmatpush.bf16.msrb.mxu3 %v1673_v27  ;;  %v351_v45 = vld [vmem:[%s1875_s10 + $0x70] sm:$0xff]  ;;  %v352_v46 = vld [vmem:[%s1875_s10 + $0x78] sm:$0xff]  ;;  %v1659_v49 = vld [vmem:[%s2134_s3 + $0x8] sm:$0xff] }
  0x18   : > { %694 = vmatpush.bf16.msrb.mxu2 %v1665_v28  ;;  %v360_v47 = vpack.c.bf16 %v352_v46, %v351_v45  ;;  %v1658_v50 = vld [vmem:[%s2134_s3] sm:$0xff]  ;;  %v1681_v34 = vld [vmem:[%s2136_s5 + $0x38] sm:$0xff] }
  0x19   : > { %v1666_v51 = vld [vmem:[%s2134_s3 + $0x40] sm:$0xff]  ;;  %884 = vmatpush.bf16.msrb.mxu0 %v1681_v34 }
  0x1a   : > { %v365_v52 = vld [vmem:[%s2133_s2] sm:$0x3] }
  0x1b   : > { %744 = vmatpush.bf16.msrb.mxu3 %v1672_v29  ;;  %v1960_v55 = vperm.slane %v365_v52, 0  ;;  %v1962_v56 = vperm.slane %v365_v52, 1 }
  0x1c   : > { %695 = vmatpush.bf16.msrb.mxu2 %v1664_v30 }
  0x1f   : > { %745 = vmatpush.bf16.msrb.mxu3 %v1671_v31 }
  0x20   : > { %696 = vmatpush.bf16.msrb.mxu2 %v1663_v32 }
  0x23   : > { %746 = vmatpush.bf16.msrb.mxu3 %v1670_v35 }
  0x24   : > { %697 = vmatpush.bf16.msrb.mxu2 %v1662_v38 }
  0x25   : > { %1493 = vmatmul.msk.bf16.gmra.mxu0 %vm391_vm0, %v354_v17 }
  0x26   : > { %1501 = vmatmul.msk.bf16.gmra.mxu1 %vm391_vm0, %v354_v17  ;;  %1505 = vmatmul.msk.bf16.gmra.mxu3 %vm391_vm0, %v358_v26 }
  0x27   : > { %1498 = vmatmul.msk.bf16.gmra.mxu2 %vm391_vm0, %v359_v40  ;;  %747 = vmatpush.bf16.msrb.mxu3 %v1669_v41 }
  0x28   : > { %698 = vmatpush.bf16.msrb.mxu2 %v1661_v42 }
  0x2b   : > { %748 = vmatpush.bf16.msrb.mxu3 %v1668_v43 }
  0x2c   : > { %699 = vmatpush.bf16.msrb.mxu2 %v1660_v44 }
  0x2f   : > { %749 = vmatpush.bf16.msrb.mxu3 %v1667_v48 }
  0x30   : > { %700 = vmatpush.bf16.msrb.mxu2 %v1659_v49 }
  0x33   : > { %750 = vmatpush.bf16.msrb.mxu3 %v1666_v51  ;;  %v1680_v51 = vld [vmem:[%s2136_s5 + $0x30] sm:$0xff] }
  0x34   : > { %701 = vmatpush.bf16.msrb.mxu2 %v1658_v50  ;;  %885 = vmatpush.bf16.msrb.mxu0 %v1680_v51 }
  0x35   : > { %1494 = vmatmul.msk.bf16.gmra.mxu0 %vm391_vm0, %v355_v23 }
  0x36   : > { %1502 = vmatmul.msk.bf16.gmra.mxu1 %vm391_vm0, %v355_v23  ;;  %1506 = vmatmul.msk.bf16.gmra.mxu3 %vm391_vm0, %v359_v40 }
  0x37   : > { %1499 = vmatmul.msk.bf16.gmra.mxu2 %vm391_vm0, %v360_v47 }
  0x38   : > { %1694 = vmatpush.bf16.msra.mxu2 %v1681_v34 }
  0x3c   : > { %1695 = vmatpush.bf16.msra.mxu2 %v1680_v51 }
  0x45   : > { %1495 = vmatmul.msk.bf16.gmra.mxu0 %vm391_vm0, %v356_v39 }
  0x46   : > { %1503 = vmatmul.msk.bf16.gmra.mxu1 %vm391_vm0, %v356_v39  ;;  %1507 = vmatmul.msk.bf16.gmra.mxu3 %vm391_vm0, %v360_v47 }
  0x55   : > { %1496 = vmatmul.msk.bf16.gmra.mxu0 %vm391_vm0, %v357_v20 }
  0x92   : > { %v425_v53 = vpop.f32.mrf.mxu0 }
  0x93   : > { %v474_v54 = vpop.f32.mrf.mxu1  ;;  %v426_v57 = vadd.f32 %v425_v53, %v1960_v55 }
  0x94   : > { %v475_v58 = vadd.f32 %v474_v54, %v1962_v56  ;;  %v1679_v54 = vld [vmem:[%s2136_s5 + $0x28] sm:$0xff] }
  0x95   : > { %v514_v63 = vmax.f32 %v426_v57, 0.0  ;;  %886 = vmatpush.bf16.msrb.mxu0 %v1679_v54  ;;  %1696 = vmatpush.bf16.msra.mxu2 %v1679_v54 }
  0x96   : > { %v515_v0 = vmax.f32 %v475_v58, 0.0 }
  0x99   : > { %v494_v31 = vpop.f32.mrf.mxu3 }
  0x9a   : > { %v427_v59 = vpop.f32.mrf.mxu0  ;;  %v450_v50 = vpop.f32.mrf.mxu2  ;;  %v495_v57 = vadd.f32 %v494_v31, %v1962_v56 }
  0x9b   : > { %v476_v60 = vpop.f32.mrf.mxu1  ;;  %v428_v61 = vadd.f32 %v427_v59, %v1960_v55 }
  0x9c   : > { %v477_v62 = vadd.f32 %v476_v60, %v1962_v56 }
  0x9d   : > { %v516_v1 = vmax.f32 %v428_v61, 0.0  ;;  %v531_v61 = vmax.f32 %v495_v57, 0.0 }
  0x9e   : > { %v517_v2 = vmax.f32 %v477_v62, 0.0 }
  0x9f   : > { %v546_v3 = vpack.c.bf16 %v516_v1, %v514_v63 }
  0xa0   : > { %v547_v4 = vpack.c.bf16 %v517_v2, %v515_v0 }
  0xa1   : > { %702 = vmatmul.bf16.vlgmr.msrb.gmra.mxu2 %v546_v3  ;;  %v496_v37 = vpop.f32.mrf.mxu3 }
  0xa2   : > { %751 = vmatmul.bf16.vlgmr.msrb.gmra.mxu3 %v547_v4  ;;  %v430_v5 = vpop.f32.mrf.mxu0  ;;  %v497_v58 = vadd.f32 %v496_v37, %v1962_v56  ;;  %v452_v0 = vpop.f32.mrf.mxu2 }
  0xa3   : > { %v479_v6 = vpop.f32.mrf.mxu1  ;;  %v431_v7 = vadd.f32 %v430_v5, %v1960_v55 }
  0xa4   : > { %v480_v8 = vadd.f32 %v479_v6, %v1962_v56  ;;  %v533_v62 = vmax.f32 %v497_v58, 0.0  ;;  %v1678_v6 = vld [vmem:[%s2136_s5 + $0x20] sm:$0xff] }
  0xa5   : > { %v518_v13 = vmax.f32 %v431_v7, 0.0  ;;  %887 = vmatpush.bf16.msrb.mxu0 %v1678_v6  ;;  %1697 = vmatpush.bf16.msra.mxu2 %v1678_v6 }
  0xa6   : > { %v519_v14 = vmax.f32 %v480_v8, 0.0  ;;  %v555_v5 = vpack.c.bf16 %v533_v62, %v531_v61 }
  0xa9   : > { %v499_v53 = vpop.f32.mrf.mxu3 }
  0xaa   : > { %v432_v9 = vpop.f32.mrf.mxu0  ;;  %v455_v7 = vpop.f32.mrf.mxu2 }
  0xab   : > { %v481_v10 = vpop.f32.mrf.mxu1  ;;  %v433_v11 = vadd.f32 %v432_v9, %v1960_v55  ;;  %v451_v9 = vadd.f32 %v450_v50, %v1960_v55 }
  0xac   : > { %v482_v12 = vadd.f32 %v481_v10, %v1962_v56  ;;  %v500_v10 = vadd.f32 %v499_v53, %v1962_v56 }
  0xad   : > { %v520_v15 = vmax.f32 %v433_v11, 0.0  ;;  %v453_v11 = vadd.f32 %v452_v0, %v1960_v55 }
  0xae   : > { %v521_v16 = vmax.f32 %v482_v12, 0.0 }
  0xaf   : > { %v548_v17 = vpack.c.bf16 %v520_v15, %v518_v13  ;;  %v534_v13 = vmax.f32 %v451_v9, 0.0  ;;  %v536_v15 = vmax.f32 %v453_v11, 0.0 }
  0xb0   : > { %v549_v18 = vpack.c.bf16 %v521_v16, %v519_v14  ;;  %v535_v14 = vmax.f32 %v500_v10, 0.0 }
  0xb1   : > { %707 = vmatmul.bf16.gmra.mxu2 %v548_v17  ;;  %v501_v1 = vpop.f32.mrf.mxu3  ;;  %v556_v17 = vpack.c.bf16 %v536_v15, %v534_v13 }
  0xb2   : > { %756 = vmatmul.bf16.gmra.mxu3 %v549_v18  ;;  %v435_v19 = vpop.f32.mrf.mxu0  ;;  %v502_v12 = vadd.f32 %v501_v1, %v1962_v56 }
  0xb3   : > { %v484_v20 = vpop.f32.mrf.mxu1  ;;  %v436_v21 = vadd.f32 %v435_v19, %v1960_v55  ;;  %v457_v19 = vpop.f32.mrf.mxu2 }
  0xb4   : > { %v485_v22 = vadd.f32 %v484_v20, %v1962_v56  ;;  %v537_v16 = vmax.f32 %v502_v12, 0.0 }
  0xb5   : > { %v522_v27 = vmax.f32 %v436_v21, 0.0  ;;  %v1677_v21 = vld [vmem:[%s2136_s5 + $0x18] sm:$0xff] }
  0xb6   : > { %v523_v28 = vmax.f32 %v485_v22, 0.0  ;;  %v557_v18 = vpack.c.bf16 %v537_v16, %v535_v14  ;;  %888 = vmatpush.bf16.msrb.mxu0 %v1677_v21  ;;  %v1676_v22 = vld [vmem:[%s2136_s5 + $0x10] sm:$0xff]  ;;  %1698 = vmatpush.bf16.msra.mxu2 %v1677_v21 }
  0xb9   : > { %v504_v8 = vpop.f32.mrf.mxu3 }
  0xba   : > { %v437_v23 = vpop.f32.mrf.mxu0  ;;  %889 = vmatpush.bf16.msrb.mxu0 %v1676_v22  ;;  %1699 = vmatpush.bf16.msra.mxu2 %v1676_v22 }
  0xbb   : > { %v486_v24 = vpop.f32.mrf.mxu1  ;;  %v438_v25 = vadd.f32 %v437_v23, %v1960_v55  ;;  %v456_v23 = vadd.f32 %v455_v7, %v1960_v55 }
  0xbc   : > { %v487_v26 = vadd.f32 %v486_v24, %v1962_v56  ;;  %v505_v24 = vadd.f32 %v504_v8, %v1962_v56 }
  0xbd   : > { %v524_v29 = vmax.f32 %v438_v25, 0.0  ;;  %v458_v25 = vadd.f32 %v457_v19, %v1960_v55 }
  0xbe   : > { %v525_v30 = vmax.f32 %v487_v26, 0.0 }
  0xbf   : > { %v550_v32 = vpack.c.bf16 %v524_v29, %v522_v27  ;;  %v460_v27 = vpop.f32.mrf.mxu2  ;;  %v538_v29 = vmax.f32 %v456_v23, 0.0  ;;  %v540_v31 = vmax.f32 %v458_v25, 0.0 }
  0xc0   : > { %v551_v33 = vpack.c.bf16 %v525_v30, %v523_v28  ;;  %v539_v30 = vmax.f32 %v505_v24, 0.0  ;;  %v461_v37 = vadd.f32 %v460_v27, %v1960_v55 }
  0xc1   : > { %712 = vmatmul.bf16.gmra.mxu2 %v550_v32  ;;  %v506_v20 = vpop.f32.mrf.mxu3 }
  0xc2   : > { %761 = vmatmul.bf16.gmra.mxu3 %v551_v33  ;;  %v440_v35 = vpop.f32.mrf.mxu0  ;;  %v507_v26 = vadd.f32 %v506_v20, %v1962_v56  ;;  %v558_v33 = vpack.c.bf16 %v540_v31, %v538_v29 }
  0xc3   : > { %v489_v36 = vpop.f32.mrf.mxu1  ;;  %v441_v38 = vadd.f32 %v440_v35, %v1960_v55 }
  0xc4   : > { %v490_v39 = vadd.f32 %v489_v36, %v1962_v56  ;;  %v541_v32 = vmax.f32 %v507_v26, 0.0 }
  0xc5   : > { %v526_v44 = vmax.f32 %v441_v38, 0.0 }
  0xc6   : > { %v527_v45 = vmax.f32 %v490_v39, 0.0  ;;  %v559_v34 = vpack.c.bf16 %v541_v32, %v539_v30 }
  0xc7   : > { %v462_v35 = vpop.f32.mrf.mxu2 }
  0xc8   : > { %v463_v39 = vadd.f32 %v462_v35, %v1960_v55 }
  0xc9   : > { %v509_v28 = vpop.f32.mrf.mxu3 }
  0xca   : > { %v442_v40 = vpop.f32.mrf.mxu0  ;;  %v510_v38 = vadd.f32 %v509_v28, %v1962_v56 }
  0xcb   : > { %v491_v41 = vpop.f32.mrf.mxu1  ;;  %v443_v42 = vadd.f32 %v442_v40, %v1960_v55 }
  0xcc   : > { %v492_v43 = vadd.f32 %v491_v41, %v1962_v56  ;;  %v1675_v41 = vld [vmem:[%s2136_s5 + $0x8] sm:$0xff] }
  0xcd   : > { %v528_v46 = vmax.f32 %v443_v42, 0.0  ;;  %v542_v42 = vmax.f32 %v461_v37, 0.0  ;;  %890 = vmatpush.bf16.msrb.mxu0 %v1675_v41  ;;  %1700 = vmatpush.bf16.msra.mxu2 %v1675_v41  ;;  %v1688_v41 = vld [vmem:[%s2138_s7 + $0x30] sm:$0xff] }
  0xce   : > { %v529_v47 = vmax.f32 %v492_v43, 0.0  ;;  %v543_v43 = vmax.f32 %v510_v38, 0.0 }
  0xcf   : > { %v552_v48 = vpack.c.bf16 %v528_v46, %v526_v44  ;;  %v544_v44 = vmax.f32 %v463_v39, 0.0 }
  0xd0   : > { %v553_v49 = vpack.c.bf16 %v529_v47, %v527_v45 }
  0xd1   : > { %717 = vmatmul.bf16.gmra.mxu2 %v552_v48  ;;  %v511_v36 = vpop.f32.mrf.mxu3  ;;  %v560_v46 = vpack.c.bf16 %v544_v44, %v542_v42  ;;  %v1674_v48 = vld [vmem:[%s2136_s5] sm:$0xff] }
  0xd2   : > { %766 = vmatmul.bf16.gmra.mxu3 %v553_v49  ;;  %v445_v52 = vpop.f32.mrf.mxu0  ;;  %v512_v40 = vadd.f32 %v511_v36, %v1962_v56  ;;  %891 = vmatpush.bf16.msrb.mxu0 %v1674_v48  ;;  %v2023_v49 = vld [vmem:[%s2135_s4] ss:$0 sm:$0xff] }
  0xd3   : > { %v446_v59 = vadd.f32 %v445_v52, %v1960_v55  ;;  %1701 = vmatpush.bf16.msra.mxu2 %v1674_v48 }
  0xd4   : > { %v545_v45 = vmax.f32 %v512_v40, 0.0 }
  0xd5   : > { %v530_v2 = vmax.f32 %v446_v59, 0.0 }
  0xd6   : > { %v561_v47 = vpack.c.bf16 %v545_v45, %v543_v43 }
  0xda   : > { %v447_v60 = vpop.f32.mrf.mxu0 }
  0xdb   : > { %v448_v63 = vadd.f32 %v447_v60, %v1960_v55 }
  0xdd   : > { %v532_v3 = vmax.f32 %v448_v63, 0.0 }
  0xdf   : > { %v554_v4 = vpack.c.bf16 %v532_v3, %v530_v2 }
  0xe1   : > { %722 = vmatmul.bf16.gmra.mxu2 %v554_v4 }
  0xe2   : > { %771 = vmatmul.bf16.gmra.mxu3 %v555_v5 }
  0xf1   : > { %727 = vmatmul.bf16.gmra.mxu2 %v556_v17 }
  0xf2   : > { %776 = vmatmul.bf16.gmra.mxu3 %v557_v18 }
 0x101   : > { %732 = vmatmul.bf16.gmra.mxu2 %v558_v33  ;;  %v1689_v33 = vld [vmem:[%s2138_s7 + $0x38] sm:$0xff] }
 0x102   : > { %781 = vmatmul.bf16.gmra.mxu3 %v559_v34  ;;  %1021 = vmatpush.bf16.msrb.mxu1 %v1689_v33 }
 0x106   : > { %1022 = vmatpush.bf16.msrb.mxu1 %v1688_v41 }
 0x111   : > { %737 = vmatmul.bf16.gmra.mxu2 %v560_v46  ;;  %v1687_v46 = vld [vmem:[%s2138_s7 + $0x28] sm:$0xff] }
 0x112   : > { %786 = vmatmul.bf16.gmra.mxu3 %v561_v47  ;;  %1023 = vmatpush.bf16.msrb.mxu1 %v1687_v46 }
 0x124   : > { %v703_v55 = vpop.f32.mrf.mxu2 }
 0x125   : > { %v752_v56 = vpop.f32.mrf.mxu3  ;;  %v704_v50 = vadd.f32 %v2023_v49, %v703_v55 }
 0x127   : > { %v753_v53 = vadd.f32 %v752_v56, %v704_v50 }
 0x129   : > { %v792_v58 = vmax.f32 %v753_v53, 0.0 }
 0x12c   : > { %v705_v51 = vpop.f32.mrf.mxu2 }
 0x12d   : > { %v754_v52 = vpop.f32.mrf.mxu3  ;;  %v706_v54 = vadd.f32 %v2023_v49, %v705_v51 }
 0x12f   : > { %v755_v57 = vadd.f32 %v754_v52, %v706_v54  ;;  %v1686_v54 = vld [vmem:[%s2138_s7 + $0x20] sm:$0xff] }
 0x130   : > { %1024 = vmatpush.bf16.msrb.mxu1 %v1686_v54 }
 0x131   : > { %v793_v59 = vmax.f32 %v755_v57, 0.0 }
 0x133   : > { %v808_v60 = vpack.c.bf16 %v793_v59, %v792_v58  ;;  %v1685_v59 = vld [vmem:[%s2138_s7 + $0x18] sm:$0xff] }
 0x134   : > { %v708_v61 = vpop.f32.mrf.mxu2  ;;  %1025 = vmatpush.bf16.msrb.mxu1 %v1685_v59 }
 0x135   : > { %v757_v62 = vpop.f32.mrf.mxu3  ;;  %892 = vmatmul.bf16.vlgmr.msrb.gmra.mxu0 %v808_v60  ;;  %v709_v63 = vadd.f32 %v2023_v49, %v708_v61  ;;  %v1684_v61 = vld [vmem:[%s2138_s7 + $0x10] sm:$0xff] }
 0x137   : > { %v758_v2 = vadd.f32 %v757_v62, %v709_v63 }
 0x138   : > { %1026 = vmatpush.bf16.msrb.mxu1 %v1684_v61 }
 0x139   : > { %v794_v5 = vmax.f32 %v758_v2, 0.0 }
 0x13c   : > { %v710_v0 = vpop.f32.mrf.mxu2 }
 0x13d   : > { %v759_v1 = vpop.f32.mrf.mxu3  ;;  %v711_v3 = vadd.f32 %v2023_v49, %v710_v0 }
 0x13f   : > { %v760_v4 = vadd.f32 %v759_v1, %v711_v3 }
 0x141   : > { %v795_v6 = vmax.f32 %v760_v4, 0.0 }
 0x143   : > { %v809_v7 = vpack.c.bf16 %v795_v6, %v794_v5 }
 0x144   : > { %v713_v8 = vpop.f32.mrf.mxu2 }
 0x145   : > { %v762_v9 = vpop.f32.mrf.mxu3  ;;  %897 = vmatmul.bf16.gmra.mxu0 %v809_v7  ;;  %v714_v10 = vadd.f32 %v2023_v49, %v713_v8  ;;  %v1683_v8 = vld [vmem:[%s2138_s7 + $0x8] sm:$0xff] }
 0x146   : > { %1027 = vmatpush.bf16.msrb.mxu1 %v1683_v8 }
 0x147   : > { %v763_v13 = vadd.f32 %v762_v9, %v714_v10 }
 0x149   : > { %v796_v16 = vmax.f32 %v763_v13, 0.0 }
 0x14c   : > { %v715_v11 = vpop.f32.mrf.mxu2 }
 0x14d   : > { %v764_v12 = vpop.f32.mrf.mxu3  ;;  %v716_v14 = vadd.f32 %v2023_v49, %v715_v11  ;;  %v1682_v11 = vld [vmem:[%s2138_s7] sm:$0xff] }
 0x14e   : > { %1028 = vmatpush.bf16.msrb.mxu1 %v1682_v11 }
 0x14f   : > { %v765_v15 = vadd.f32 %v764_v12, %v716_v14 }
 0x151   : > { %v797_v17 = vmax.f32 %v765_v15, 0.0 }
 0x153   : > { %v810_v18 = vpack.c.bf16 %v797_v17, %v796_v16 }
 0x154   : > { %v718_v19 = vpop.f32.mrf.mxu2 }
 0x155   : > { %v767_v20 = vpop.f32.mrf.mxu3  ;;  %902 = vmatmul.bf16.gmra.mxu0 %v810_v18  ;;  %v719_v21 = vadd.f32 %v2023_v49, %v718_v19 }
 0x157   : > { %v768_v24 = vadd.f32 %v767_v20, %v719_v21  ;;  %v1711_v20 = vld [vmem:[%s2137_s6] ss:$0 sm:$0xff] }
 0x159   : > { %v798_v27 = vmax.f32 %v768_v24, 0.0 }
 0x15c   : > { %v720_v22 = vpop.f32.mrf.mxu2 }
 0x15d   : > { %v769_v23 = vpop.f32.mrf.mxu3  ;;  %v721_v25 = vadd.f32 %v2023_v49, %v720_v22 }
 0x15f   : > { %v770_v26 = vadd.f32 %v769_v23, %v721_v25 }
 0x161   : > { %v799_v28 = vmax.f32 %v770_v26, 0.0 }
 0x163   : > { %v811_v29 = vpack.c.bf16 %v799_v28, %v798_v27 }
 0x164   : > { %v723_v30 = vpop.f32.mrf.mxu2 }
 0x165   : > { %v772_v31 = vpop.f32.mrf.mxu3  ;;  %907 = vmatmul.bf16.gmra.mxu0 %v811_v29  ;;  %v724_v32 = vadd.f32 %v2023_v49, %v723_v30 }
 0x167   : > { %v773_v36 = vadd.f32 %v772_v31, %v724_v32 }
 0x169   : > { %v800_v39 = vmax.f32 %v773_v36, 0.0 }
 0x16c   : > { %v725_v34 = vpop.f32.mrf.mxu2 }
 0x16d   : > { %v774_v35 = vpop.f32.mrf.mxu3  ;;  %v726_v37 = vadd.f32 %v2023_v49, %v725_v34 }
 0x16f   : > { %v775_v38 = vadd.f32 %v774_v35, %v726_v37 }
 0x171   : > { %v801_v40 = vmax.f32 %v775_v38, 0.0 }
 0x173   : > { %v812_v42 = vpack.c.bf16 %v801_v40, %v800_v39 }
 0x174   : > { %v728_v43 = vpop.f32.mrf.mxu2 }
 0x175   : > { %v777_v44 = vpop.f32.mrf.mxu3  ;;  %912 = vmatmul.bf16.gmra.mxu0 %v812_v42  ;;  %v729_v45 = vadd.f32 %v2023_v49, %v728_v43 }
 0x177   : > { %v778_v55 = vadd.f32 %v777_v44, %v729_v45 }
 0x179   : > { %v802_v51 = vmax.f32 %v778_v55, 0.0 }
 0x17c   : > { %v730_v47 = vpop.f32.mrf.mxu2 }
 0x17d   : > { %v779_v48 = vpop.f32.mrf.mxu3  ;;  %v731_v56 = vadd.f32 %v2023_v49, %v730_v47 }
 0x17f   : > { %v780_v50 = vadd.f32 %v779_v48, %v731_v56 }
 0x181   : > { %v803_v52 = vmax.f32 %v780_v50, 0.0 }
 0x183   : > { %v813_v53 = vpack.c.bf16 %v803_v52, %v802_v51 }
 0x184   : > { %v733_v57 = vpop.f32.mrf.mxu2 }
 0x185   : > { %v782_v58 = vpop.f32.mrf.mxu3  ;;  %917 = vmatmul.bf16.gmra.mxu0 %v813_v53  ;;  %v734_v60 = vadd.f32 %v2023_v49, %v733_v57 }
 0x187   : > { %v783_v0 = vadd.f32 %v782_v58, %v734_v60 }
 0x189   : > { %v804_v3 = vmax.f32 %v783_v0, 0.0 }
 0x18c   : > { %v735_v62 = vpop.f32.mrf.mxu2 }
 0x18d   : > { %v784_v63 = vpop.f32.mrf.mxu3  ;;  %v736_v1 = vadd.f32 %v2023_v49, %v735_v62 }
 0x18f   : > { %v785_v2 = vadd.f32 %v784_v63, %v736_v1 }
 0x191   : > { %v805_v4 = vmax.f32 %v785_v2, 0.0 }
 0x193   : > { %v814_v5 = vpack.c.bf16 %v805_v4, %v804_v3 }
 0x194   : > { %v738_v6 = vpop.f32.mrf.mxu2 }
 0x195   : > { %v787_v7 = vpop.f32.mrf.mxu3  ;;  %922 = vmatmul.bf16.gmra.mxu0 %v814_v5  ;;  %v739_v9 = vadd.f32 %v2023_v49, %v738_v6 }
 0x197   : > { %v788_v12 = vadd.f32 %v787_v7, %v739_v9 }
 0x199   : > { %v806_v16 = vmax.f32 %v788_v12, 0.0  ;;  %v2071_v12 = vld [vmem:[%s2139_s8] ss:$0 sm:$0xff] }
 0x19c   : > { %v740_v10 = vpop.f32.mrf.mxu2 }
 0x19d   : > { %v741_v13 = vadd.f32 %v2023_v49, %v740_v10  ;;  %v789_v14 = vpop.f32.mrf.mxu3 }
 0x19f   : > { %v790_v15 = vadd.f32 %v789_v14, %v741_v13 }
 0x1a1   : > { %v807_v17 = vmax.f32 %v790_v15, 0.0 }
 0x1a3   : > { %v815_v18 = vpack.c.bf16 %v807_v17, %v806_v16 }
 0x1a5   : > { %927 = vmatmul.bf16.vlgmr.msra.gmra.mxu2 %v815_v18 }
 0x1b2   : > { %v893_v19 = vpop.f32.mrf.mxu0 }
 0x1b3   : > { %v894_v21 = vadd.f32 %v1711_v20, %v893_v19 }
 0x1b5   : > { %v933_v24 = vmax.f32 %v894_v21, 0.0 }
 0x1ba   : > { %v895_v22 = vpop.f32.mrf.mxu0 }
 0x1bb   : > { %v896_v23 = vadd.f32 %v1711_v20, %v895_v22 }
 0x1bd   : > { %v934_v25 = vmax.f32 %v896_v23, 0.0 }
 0x1bf   : > { %v949_v26 = vpack.c.bf16 %v934_v25, %v933_v24 }
 0x1c1   : > { %1029 = vmatmul.bf16.vlgmr.msrb.gmra.mxu1 %v949_v26 }
 0x1c2   : > { %v898_v49 = vpop.f32.mrf.mxu0 }
 0x1c3   : > { %v899_v27 = vadd.f32 %v1711_v20, %v898_v49 }
 0x1c5   : > { %v935_v30 = vmax.f32 %v899_v27, 0.0 }
 0x1ca   : > { %v900_v28 = vpop.f32.mrf.mxu0 }
 0x1cb   : > { %v901_v29 = vadd.f32 %v1711_v20, %v900_v28 }
 0x1cd   : > { %v936_v31 = vmax.f32 %v901_v29, 0.0 }
 0x1cf   : > { %v950_v32 = vpack.c.bf16 %v936_v31, %v935_v30 }
 0x1d1   : > { %1034 = vmatmul.bf16.gmra.mxu1 %v950_v32 }
 0x1d2   : > { %v903_v33 = vpop.f32.mrf.mxu0 }
 0x1d3   : > { %v904_v34 = vadd.f32 %v1711_v20, %v903_v33 }
 0x1d5   : > { %v937_v37 = vmax.f32 %v904_v34, 0.0 }
 0x1da   : > { %v905_v35 = vpop.f32.mrf.mxu0 }
 0x1db   : > { %v906_v36 = vadd.f32 %v1711_v20, %v905_v35 }
 0x1dd   : > { %v938_v38 = vmax.f32 %v906_v36, 0.0 }
 0x1df   : > { %v951_v39 = vpack.c.bf16 %v938_v38, %v937_v37 }
 0x1e1   : > { %1039 = vmatmul.bf16.gmra.mxu1 %v951_v39 }
 0x1e2   : > { %v908_v40 = vpop.f32.mrf.mxu0 }
 0x1e3   : > { %v909_v41 = vadd.f32 %v1711_v20, %v908_v40 }
 0x1e5   : > { %v939_v44 = vmax.f32 %v909_v41, 0.0 }
 0x1ea   : > { %v910_v42 = vpop.f32.mrf.mxu0 }
 0x1eb   : > { %v911_v43 = vadd.f32 %v1711_v20, %v910_v42 }
 0x1ed   : > { %v940_v45 = vmax.f32 %v911_v43, 0.0 }
 0x1ef   : > { %v952_v46 = vpack.c.bf16 %v940_v45, %v939_v44 }
 0x1f1   : > { %1044 = vmatmul.bf16.gmra.mxu1 %v952_v46 }
 0x1f2   : > { %v913_v47 = vpop.f32.mrf.mxu0 }
 0x1f3   : > { %v914_v48 = vadd.f32 %v1711_v20, %v913_v47 }
 0x1f5   : > { %v941_v50 = vmax.f32 %v914_v48, 0.0 }
 0x1fa   : > { %v915_v55 = vpop.f32.mrf.mxu0 }
 0x1fb   : > { %v916_v56 = vadd.f32 %v1711_v20, %v915_v55 }
 0x1fd   : > { %v942_v51 = vmax.f32 %v916_v56, 0.0 }
 0x1ff   : > { %v953_v52 = vpack.c.bf16 %v942_v51, %v941_v50 }
 0x201   : > { %1049 = vmatmul.bf16.gmra.mxu1 %v953_v52 }
 0x202   : > { %v918_v53 = vpop.f32.mrf.mxu0 }
 0x203   : > { %v919_v54 = vadd.f32 %v1711_v20, %v918_v53 }
 0x205   : > { %v943_v59 = vmax.f32 %v919_v54, 0.0 }
 0x20a   : > { %v920_v57 = vpop.f32.mrf.mxu0 }
 0x20b   : > { %v921_v58 = vadd.f32 %v1711_v20, %v920_v57 }
 0x20d   : > { %v944_v60 = vmax.f32 %v921_v58, 0.0 }
 0x20f   : > { %v954_v61 = vpack.c.bf16 %v944_v60, %v943_v59 }
 0x211   : > { %1054 = vmatmul.bf16.gmra.mxu1 %v954_v61 }
 0x212   : > { %v923_v62 = vpop.f32.mrf.mxu0 }
 0x213   : > { %v924_v63 = vadd.f32 %v1711_v20, %v923_v62 }
 0x215   : > { %v945_v2 = vmax.f32 %v924_v63, 0.0 }
 0x21a   : > { %v925_v0 = vpop.f32.mrf.mxu0 }
 0x21b   : > { %v926_v1 = vadd.f32 %v1711_v20, %v925_v0 }
 0x21d   : > { %v946_v3 = vmax.f32 %v926_v1, 0.0 }
 0x21f   : > { %v955_v4 = vpack.c.bf16 %v946_v3, %v945_v2 }
 0x221   : > { %1059 = vmatmul.bf16.gmra.mxu1 %v955_v4 }
 0x228   : > { %v928_v5 = vpop.f32.mrf.mxu2 }
 0x229   : > { %v929_v6 = vadd.f32 %v1711_v20, %v928_v5 }
 0x22b   : > { %v947_v9 = vmax.f32 %v929_v6, 0.0 }
 0x230   : > { %v930_v7 = vpop.f32.mrf.mxu2 }
 0x231   : > { %v931_v8 = vadd.f32 %v1711_v20, %v930_v7 }
 0x233   : > { %v948_v10 = vmax.f32 %v931_v8, 0.0 }
 0x235   : > { %v956_v11 = vpack.c.bf16 %v948_v10, %v947_v9 }
 0x237   : > { %1064 = vmatmul.bf16.gmra.mxu1 %v956_v11 }
 0x23e   : > { %v1030_v13 = vpop.f32.mrf.mxu1 }
 0x23f   : > { %v1074_v14 = vadd.f32 %v2071_v12, %v1030_v13 }
 0x241   : > { %v1636_v15 = vmul.f32 -1.442695, %v1074_v14 }
 0x243   : > { %1713 = vpow2.f32 %v1636_v15 }
 0x246   : > { %v1032_v16 = vpop.f32.mrf.mxu1 }
 0x247   : > { %v1075_v17 = vadd.f32 %v2071_v12, %v1032_v16 }
 0x249   : > { %v1714_v18 = vpop.eup %1713  ;;  %v1637_v19 = vmul.f32 -1.442695, %v1075_v17 }
 0x24a   : > { %v1138_v20 = vadd.f32 1.0, %v1714_v18 }
 0x24b   : > { %1715 = vpow2.f32 %v1637_v19 }
 0x24c   : > { %1717 = vrcp.f32 %v1138_v20  ;;  %v1165_v28 = vand.u32 2147483648, %v1138_v20  ;;  %v1163_v31 = vand.u32 2147483647, %v1138_v20  ;;  %vm1159_vm2 = vweird.f32 %v1138_v20 }
 0x24e   : > { %v1035_v21 = vpop.f32.mrf.mxu1  ;;  %v1166_v37 = vor.u32 1.1754944e-38, %v1165_v28  ;;  %vm1164_vm5 = vcmp.eq.f32.partialorder %v1163_v31, 8.507059e+37 }
 0x24f   : > { %v1076_v22 = vadd.f32 %v2071_v12, %v1035_v21 }
 0x251   : > { %v1716_v23 = vpop.eup %1715  ;;  %v1638_v24 = vmul.f32 -1.442695, %v1076_v22 }
 0x252   : > { %v1718_v25 = vpop.eup %1717  ;;  %v1139_v26 = vadd.f32 1.0, %v1716_v23 }
 0x253   : > { %v1155_v49 = vmul.f32 %v1718_v25, %v1138_v20  ;;  %1719 = vpow2.f32 %v1638_v24  ;;  %vm1160_vm1 = vweird.f32 %v1718_v25 }
 0x254   : > { %1721 = vrcp.f32 %v1139_v26  ;;  %vm1161_vm3 = vmor %vm1159_vm2, %vm1160_vm1  ;;  %v1180_v43 = vand.u32 2147483648, %v1139_v26  ;;  %v1178_v46 = vand.u32 2147483647, %v1139_v26  ;;  %vm1174_vm7 = vweird.f32 %v1139_v26 }
 0x255   : > { %v1156_v27 = vsub.f32 1.0, %v1155_v49 }
 0x256   : > { %v1037_v29 = vpop.f32.mrf.mxu1  ;;  %v1181_v51 = vor.u32 1.1754944e-38, %v1180_v43  ;;  %vm1179_vm9 = vcmp.eq.f32.partialorder %v1178_v46, 8.507059e+37 }
 0x257   : > { %v1157_v30 = vmul.f32 %v1718_v25, %v1156_v27  ;;  %v1077_v32 = vadd.f32 %v2071_v12, %v1037_v29 }
 0x259   : > { %v1720_v33 = vpop.eup %1719  ;;  %v1158_v34 = vadd.f32 %v1718_v25, %v1157_v30  ;;  %v1639_v35 = vmul.f32 -1.442695, %v1077_v32 }
 0x25a   : > { %v1722_v36 = vpop.eup %1721  ;;  %v1140_v38 = vadd.f32 1.0, %v1720_v33 }
 0x25b   : > { %v1162_v39 = vsel %vm1161_vm3, %v1718_v25, %v1158_v34  ;;  %v1170_v40 = vmul.f32 %v1722_v36, %v1139_v26  ;;  %1723 = vpow2.f32 %v1639_v35  ;;  %vm1175_vm6 = vweird.f32 %v1722_v36 }
 0x25c   : > { %v1167_v41 = vsel %vm1164_vm5, %v1166_v37, %v1162_v39  ;;  %1725 = vrcp.f32 %v1140_v38  ;;  %vm1176_vm8 = vmor %vm1174_vm7, %vm1175_vm6  ;;  %v1195_v59 = vand.u32 2147483648, %v1140_v38  ;;  %v1193_v62 = vand.u32 2147483647, %v1140_v38 }
 0x25d   : > { %1395 = vst.msk [vmem:[%s2082_s15] sm:$0xff] %vm1394_vm4, %v1167_v41  ;;  %v1171_v42 = vsub.f32 1.0, %v1170_v40  ;;  %vm1189_vm11 = vweird.f32 %v1140_v38 }
 0x25e   : > { %v1040_v44 = vpop.f32.mrf.mxu1  ;;  %v1196_v4 = vor.u32 1.1754944e-38, %v1195_v59  ;;  %vm1194_vm13 = vcmp.eq.f32.partialorder %v1193_v62, 8.507059e+37 }
 0x25f   : > { %v1172_v45 = vmul.f32 %v1722_v36, %v1171_v42  ;;  %v1078_v47 = vadd.f32 %v2071_v12, %v1040_v44 }
 0x261   : > { %v1724_v48 = vpop.eup %1723  ;;  %v1173_v55 = vadd.f32 %v1722_v36, %v1172_v45  ;;  %v1640_v56 = vmul.f32 -1.442695, %v1078_v47 }
 0x262   : > { %v1726_v50 = vpop.eup %1725  ;;  %v1141_v52 = vadd.f32 1.0, %v1724_v48 }
 0x263   : > { %v1177_v53 = vsel %vm1176_vm8, %v1722_v36, %v1173_v55  ;;  %v1185_v54 = vmul.f32 %v1726_v50, %v1140_v38  ;;  %1727 = vpow2.f32 %v1640_v56  ;;  %vm1190_vm10 = vweird.f32 %v1726_v50 }
 0x264   : > { %v1182_v57 = vsel %vm1179_vm9, %v1181_v51, %v1177_v53  ;;  %1729 = vrcp.f32 %v1141_v52  ;;  %vm1191_vm12 = vmor %vm1189_vm11, %vm1190_vm10  ;;  %v1210_v10 = vand.u32 2147483648, %v1141_v52  ;;  %v1208_v14 = vand.u32 2147483647, %v1141_v52 }
 0x265   : > { %1396 = vst.msk [vmem:[%s2082_s15 + $0x8] sm:$0xff] %vm1394_vm4, %v1182_v57  ;;  %v1186_v58 = vsub.f32 1.0, %v1185_v54  ;;  %vm1204_vm15 = vweird.f32 %v1141_v52 }
 0x266   : > { %v1042_v60 = vpop.f32.mrf.mxu1  ;;  %v1211_v20 = vor.u32 1.1754944e-38, %v1210_v10  ;;  %vm1209_vm1 = vcmp.eq.f32.partialorder %v1208_v14, 8.507059e+37 }
 0x267   : > { %v1187_v61 = vmul.f32 %v1726_v50, %v1186_v58  ;;  %v1079_v63 = vadd.f32 %v2071_v12, %v1042_v60 }
 0x269   : > { %v1728_v0 = vpop.eup %1727  ;;  %v1188_v1 = vadd.f32 %v1726_v50, %v1187_v61  ;;  %v1641_v2 = vmul.f32 -1.442695, %v1079_v63 }
 0x26a   : > { %v1730_v3 = vpop.eup %1729  ;;  %v1142_v5 = vadd.f32 1.0, %v1728_v0 }
 0x26b   : > { %v1192_v6 = vsel %vm1191_vm12, %v1726_v50, %v1188_v1  ;;  %v1200_v7 = vmul.f32 %v1730_v3, %v1141_v52  ;;  %1731 = vpow2.f32 %v1641_v2  ;;  %vm1205_vm14 = vweird.f32 %v1730_v3 }
 0x26c   : > { %v1197_v8 = vsel %vm1194_vm13, %v1196_v4, %v1192_v6  ;;  %1733 = vrcp.f32 %v1142_v5  ;;  %vm1206_vm0 = vmor %vm1204_vm15, %vm1205_vm14  ;;  %v1225_v26 = vand.u32 2147483648, %v1142_v5  ;;  %v1223_v28 = vand.u32 2147483647, %v1142_v5 }
 0x26d   : > { %1397 = vst.msk [vmem:[%s2082_s15 + $0x10] sm:$0xff] %vm1394_vm4, %v1197_v8  ;;  %v1201_v9 = vsub.f32 1.0, %v1200_v7  ;;  %vm1219_vm3 = vweird.f32 %v1142_v5 }
 0x26e   : > { %v1045_v11 = vpop.f32.mrf.mxu1  ;;  %v1226_v34 = vor.u32 1.1754944e-38, %v1225_v26  ;;  %vm1224_vm6 = vcmp.eq.f32.partialorder %v1223_v28, 8.507059e+37 }
 0x26f   : > { %v1202_v13 = vmul.f32 %v1730_v3, %v1201_v9  ;;  %v1080_v15 = vadd.f32 %v2071_v12, %v1045_v11 }
 0x271   : > { %v1732_v16 = vpop.eup %1731  ;;  %v1203_v17 = vadd.f32 %v1730_v3, %v1202_v13  ;;  %v1642_v18 = vmul.f32 -1.442695, %v1080_v15 }
 0x272   : > { %v1734_v19 = vpop.eup %1733  ;;  %v1143_v21 = vadd.f32 1.0, %v1732_v16 }
 0x273   : > { %v1207_v22 = vsel %vm1206_vm0, %v1730_v3, %v1203_v17  ;;  %v1215_v23 = vmul.f32 %v1734_v19, %v1142_v5  ;;  %1735 = vpow2.f32 %v1642_v18  ;;  %vm1220_vm2 = vweird.f32 %v1734_v19 }
 0x274   : > { %v1212_v24 = vsel %vm1209_vm1, %v1211_v20, %v1207_v22  ;;  %1737 = vrcp.f32 %v1143_v21  ;;  %vm1221_vm5 = vmor %vm1219_vm3, %vm1220_vm2  ;;  %v1240_v40 = vand.u32 2147483648, %v1143_v21  ;;  %v1238_v43 = vand.u32 2147483647, %v1143_v21 }
 0x275   : > { %1398 = vst.msk [vmem:[%s2082_s15 + $0x18] sm:$0xff] %vm1394_vm4, %v1212_v24  ;;  %v1216_v25 = vsub.f32 1.0, %v1215_v23  ;;  %vm1234_vm8 = vweird.f32 %v1143_v21 }
 0x276   : > { %v1047_v49 = vpop.f32.mrf.mxu1  ;;  %v1241_v55 = vor.u32 1.1754944e-38, %v1240_v40  ;;  %vm1239_vm10 = vcmp.eq.f32.partialorder %v1238_v43, 8.507059e+37 }
 0x277   : > { %v1217_v27 = vmul.f32 %v1734_v19, %v1216_v25  ;;  %v1081_v29 = vadd.f32 %v2071_v12, %v1047_v49 }
 0x279   : > { %v1736_v30 = vpop.eup %1735  ;;  %v1218_v31 = vadd.f32 %v1734_v19, %v1217_v27  ;;  %v1643_v32 = vmul.f32 -1.442695, %v1081_v29 }
 0x27a   : > { %v1738_v33 = vpop.eup %1737  ;;  %v1144_v35 = vadd.f32 1.0, %v1736_v30 }
 0x27b   : > { %v1222_v36 = vsel %vm1221_vm5, %v1734_v19, %v1218_v31  ;;  %v1230_v37 = vmul.f32 %v1738_v33, %v1143_v21  ;;  %1739 = vpow2.f32 %v1643_v32  ;;  %vm1235_vm7 = vweird.f32 %v1738_v33 }
 0x27c   : > { %v1227_v38 = vsel %vm1224_vm6, %v1226_v34, %v1222_v36  ;;  %1741 = vrcp.f32 %v1144_v35  ;;  %vm1236_vm9 = vmor %vm1234_vm8, %vm1235_vm7  ;;  %v1255_v54 = vand.u32 2147483648, %v1144_v35  ;;  %v1253_v59 = vand.u32 2147483647, %v1144_v35 }
 0x27d   : > { %1399 = vst.msk [vmem:[%s2082_s15 + $0x20] sm:$0xff] %vm1394_vm4, %v1227_v38  ;;  %v1231_v39 = vsub.f32 1.0, %v1230_v37  ;;  %vm1249_vm12 = vweird.f32 %v1144_v35 }
 0x27e   : > { %v1050_v41 = vpop.f32.mrf.mxu1  ;;  %v1256_v1 = vor.u32 1.1754944e-38, %v1255_v54  ;;  %vm1254_vm14 = vcmp.eq.f32.partialorder %v1253_v59, 8.507059e+37 }
 0x27f   : > { %v1232_v42 = vmul.f32 %v1738_v33, %v1231_v39  ;;  %v1082_v44 = vadd.f32 %v2071_v12, %v1050_v41 }
 0x281   : > { %v1740_v45 = vpop.eup %1739  ;;  %v1233_v46 = vadd.f32 %v1738_v33, %v1232_v42  ;;  %v1644_v47 = vmul.f32 -1.442695, %v1082_v44 }
 0x282   : > { %v1742_v48 = vpop.eup %1741  ;;  %v1145_v56 = vadd.f32 1.0, %v1740_v45 }
 0x283   : > { %v1237_v50 = vsel %vm1236_vm9, %v1738_v33, %v1233_v46  ;;  %v1245_v51 = vmul.f32 %v1742_v48, %v1144_v35  ;;  %1743 = vpow2.f32 %v1644_v47  ;;  %vm1250_vm11 = vweird.f32 %v1742_v48 }
 0x284   : > { %v1242_v52 = vsel %vm1239_vm10, %v1241_v55, %v1237_v50  ;;  %1745 = vrcp.f32 %v1145_v56  ;;  %vm1251_vm13 = vmor %vm1249_vm12, %vm1250_vm11  ;;  %v1270_v7 = vand.u32 2147483648, %v1145_v56  ;;  %v1268_v10 = vand.u32 2147483647, %v1145_v56 }
 0x285   : > { %1400 = vst.msk [vmem:[%s2082_s15 + $0x28] sm:$0xff] %vm1394_vm4, %v1242_v52  ;;  %v1246_v53 = vsub.f32 1.0, %v1245_v51  ;;  %vm1264_vm0 = vweird.f32 %v1145_v56 }
 0x286   : > { %v1052_v57 = vpop.f32.mrf.mxu1  ;;  %v1271_v17 = vor.u32 1.1754944e-38, %v1270_v7  ;;  %vm1269_vm2 = vcmp.eq.f32.partialorder %v1268_v10, 8.507059e+37 }
 0x287   : > { %v1247_v58 = vmul.f32 %v1742_v48, %v1246_v53  ;;  %v1083_v60 = vadd.f32 %v2071_v12, %v1052_v57 }
 0x289   : > { %v1744_v61 = vpop.eup %1743  ;;  %v1248_v62 = vadd.f32 %v1742_v48, %v1247_v58  ;;  %v1645_v63 = vmul.f32 -1.442695, %v1083_v60 }
 0x28a   : > { %v1746_v0 = vpop.eup %1745  ;;  %v1146_v2 = vadd.f32 1.0, %v1744_v61 }
 0x28b   : > { %v1252_v3 = vsel %vm1251_vm13, %v1742_v48, %v1248_v62  ;;  %v1260_v4 = vmul.f32 %v1746_v0, %v1145_v56  ;;  %1747 = vpow2.f32 %v1645_v63  ;;  %vm1265_vm15 = vweird.f32 %v1746_v0 }
 0x28c   : > { %v1257_v5 = vsel %vm1254_vm14, %v1256_v1, %v1252_v3  ;;  %1749 = vrcp.f32 %v1146_v2  ;;  %vm1266_vm1 = vmor %vm1264_vm0, %vm1265_vm15  ;;  %v1285_v23 = vand.u32 2147483648, %v1146_v2  ;;  %v1283_v26 = vand.u32 2147483647, %v1146_v2 }
 0x28d   : > { %1401 = vst.msk [vmem:[%s2082_s15 + $0x30] sm:$0xff] %vm1394_vm4, %v1257_v5  ;;  %v1261_v6 = vsub.f32 1.0, %v1260_v4  ;;  %vm1279_vm5 = vweird.f32 %v1146_v2 }
 0x28e   : > { %v1055_v8 = vpop.f32.mrf.mxu1  ;;  %v1286_v31 = vor.u32 1.1754944e-38, %v1285_v23  ;;  %vm1284_vm7 = vcmp.eq.f32.partialorder %v1283_v26, 8.507059e+37 }
 0x28f   : > { %v1262_v9 = vmul.f32 %v1746_v0, %v1261_v6  ;;  %v1084_v11 = vadd.f32 %v2071_v12, %v1055_v8 }
 0x291   : > { %v1748_v13 = vpop.eup %1747  ;;  %v1263_v14 = vadd.f32 %v1746_v0, %v1262_v9  ;;  %v1646_v15 = vmul.f32 -1.442695, %v1084_v11 }
 0x292   : > { %v1750_v16 = vpop.eup %1749  ;;  %v1147_v18 = vadd.f32 1.0, %v1748_v13 }
 0x293   : > { %v1267_v19 = vsel %vm1266_vm1, %v1746_v0, %v1263_v14  ;;  %v1275_v20 = vmul.f32 %v1750_v16, %v1146_v2  ;;  %1751 = vpow2.f32 %v1646_v15  ;;  %vm1280_vm3 = vweird.f32 %v1750_v16 }
 0x294   : > { %v1272_v21 = vsel %vm1269_vm2, %v1271_v17, %v1267_v19  ;;  %1753 = vrcp.f32 %v1147_v18  ;;  %vm1281_vm6 = vmor %vm1279_vm5, %vm1280_vm3  ;;  %v1300_v37 = vand.u32 2147483648, %v1147_v18  ;;  %v1298_v40 = vand.u32 2147483647, %v1147_v18 }
 0x295   : > { %1402 = vst.msk [vmem:[%s2082_s15 + $0x38] sm:$0xff] %vm1394_vm4, %v1272_v21  ;;  %v1276_v22 = vsub.f32 1.0, %v1275_v20  ;;  %vm1294_vm9 = vweird.f32 %v1147_v18 }
 0x296   : > { %v1057_v24 = vpop.f32.mrf.mxu1  ;;  %v1301_v46 = vor.u32 1.1754944e-38, %v1300_v37  ;;  %vm1299_vm11 = vcmp.eq.f32.partialorder %v1298_v40, 8.507059e+37 }
 0x297   : > { %v1277_v25 = vmul.f32 %v1750_v16, %v1276_v22  ;;  %v1085_v49 = vadd.f32 %v2071_v12, %v1057_v24 }
 0x299   : > { %v1752_v27 = vpop.eup %1751  ;;  %v1278_v28 = vadd.f32 %v1750_v16, %v1277_v25  ;;  %v1647_v29 = vmul.f32 -1.442695, %v1085_v49 }
 0x29a   : > { %v1754_v30 = vpop.eup %1753  ;;  %v1148_v32 = vadd.f32 1.0, %v1752_v27 }
 0x29b   : > { %v1282_v33 = vsel %vm1281_vm6, %v1750_v16, %v1278_v28  ;;  %v1290_v34 = vmul.f32 %v1754_v30, %v1147_v18  ;;  %1755 = vpow2.f32 %v1647_v29  ;;  %vm1295_vm8 = vweird.f32 %v1754_v30 }
 0x29c   : > { %v1287_v35 = vsel %vm1284_vm7, %v1286_v31, %v1282_v33  ;;  %1757 = vrcp.f32 %v1148_v32  ;;  %vm1296_vm10 = vmor %vm1294_vm9, %vm1295_vm8  ;;  %v1315_v51 = vand.u32 2147483648, %v1148_v32  ;;  %v1313_v54 = vand.u32 2147483647, %v1148_v32 }
 0x29d   : > { %1403 = vst.msk [vmem:[%s2082_s15 + $0x40] sm:$0xff] %vm1394_vm4, %v1287_v35  ;;  %v1291_v36 = vsub.f32 1.0, %v1290_v34  ;;  %vm1309_vm13 = vweird.f32 %v1148_v32 }
 0x29e   : > { %v1060_v38 = vpop.f32.mrf.mxu1  ;;  %v1316_v62 = vor.u32 1.1754944e-38, %v1315_v51  ;;  %vm1314_vm15 = vcmp.eq.f32.partialorder %v1313_v54, 8.507059e+37 }
 0x29f   : > { %v1292_v39 = vmul.f32 %v1754_v30, %v1291_v36  ;;  %v1086_v41 = vadd.f32 %v2071_v12, %v1060_v38 }
 0x2a1   : > { %v1756_v42 = vpop.eup %1755  ;;  %v1293_v43 = vadd.f32 %v1754_v30, %v1292_v39  ;;  %v1648_v44 = vmul.f32 -1.442695, %v1086_v41 }
 0x2a2   : > { %v1758_v45 = vpop.eup %1757  ;;  %v1149_v47 = vadd.f32 1.0, %v1756_v42 }
 0x2a3   : > { %v1297_v48 = vsel %vm1296_vm10, %v1754_v30, %v1293_v43  ;;  %v1305_v55 = vmul.f32 %v1758_v45, %v1148_v32  ;;  %1759 = vpow2.f32 %v1648_v44  ;;  %vm1310_vm12 = vweird.f32 %v1758_v45 }
 0x2a4   : > { %v1302_v56 = vsel %vm1299_vm11, %v1301_v46, %v1297_v48  ;;  %1761 = vrcp.f32 %v1149_v47  ;;  %vm1311_vm14 = vmor %vm1309_vm13, %vm1310_vm12  ;;  %v1330_v4 = vand.u32 2147483648, %v1149_v47  ;;  %v1328_v6 = vand.u32 2147483647, %v1149_v47 }
 0x2a5   : > { %1404 = vst.msk [vmem:[%s2082_s15 + $0x48] sm:$0xff] %vm1394_vm4, %v1302_v56  ;;  %v1306_v50 = vsub.f32 1.0, %v1305_v55  ;;  %vm1324_vm1 = vweird.f32 %v1149_v47 }
 0x2a6   : > { %v1062_v52 = vpop.f32.mrf.mxu1  ;;  %v1331_v10 = vor.u32 1.1754944e-38, %v1330_v4  ;;  %vm1329_vm3 = vcmp.eq.f32.partialorder %v1328_v6, 8.507059e+37 }
 0x2a7   : > { %v1307_v53 = vmul.f32 %v1758_v45, %v1306_v50  ;;  %v1087_v57 = vadd.f32 %v2071_v12, %v1062_v52 }
 0x2a9   : > { %v1760_v58 = vpop.eup %1759  ;;  %v1308_v59 = vadd.f32 %v1758_v45, %v1307_v53  ;;  %v1649_v60 = vmul.f32 -1.442695, %v1087_v57 }
 0x2aa   : > { %v1762_v61 = vpop.eup %1761  ;;  %v1150_v63 = vadd.f32 1.0, %v1760_v58 }
 0x2ab   : > { %v1312_v0 = vsel %vm1311_vm14, %v1758_v45, %v1308_v59  ;;  %v1320_v1 = vmul.f32 %v1762_v61, %v1149_v47  ;;  %1763 = vpow2.f32 %v1649_v60  ;;  %vm1325_vm0 = vweird.f32 %v1762_v61 }
 0x2ac   : > { %v1317_v2 = vsel %vm1314_vm15, %v1316_v62, %v1312_v0  ;;  %1765 = vrcp.f32 %v1150_v63  ;;  %vm1326_vm2 = vmor %vm1324_vm1, %vm1325_vm0  ;;  %v1345_v19 = vand.u32 2147483648, %v1150_v63  ;;  %v1343_v21 = vand.u32 2147483647, %v1150_v63 }
 0x2ad   : > { %1405 = vst.msk [vmem:[%s2082_s15 + $0x50] sm:$0xff] %vm1394_vm4, %v1317_v2  ;;  %v1321_v3 = vsub.f32 1.0, %v1320_v1  ;;  %vm1339_vm6 = vweird.f32 %v1150_v63 }
 0x2ae   : > { %v1346_v25 = vor.u32 1.1754944e-38, %v1345_v19  ;;  %vm1344_vm8 = vcmp.eq.f32.partialorder %v1343_v21, 8.507059e+37 }
 0x2af   : > { %v1322_v5 = vmul.f32 %v1762_v61, %v1321_v3 }
 0x2b1   : > { %v1764_v7 = vpop.eup %1763  ;;  %v1323_v8 = vadd.f32 %v1762_v61, %v1322_v5 }
 0x2b2   : > { %v1766_v9 = vpop.eup %1765  ;;  %v1151_v11 = vadd.f32 1.0, %v1764_v7 }
 0x2b3   : > { %v1327_v13 = vsel %vm1326_vm2, %v1762_v61, %v1323_v8  ;;  %v1335_v14 = vmul.f32 %v1766_v9, %v1150_v63  ;;  %vm1340_vm5 = vweird.f32 %v1766_v9 }
 0x2b4   : > { %v1332_v15 = vsel %vm1329_vm3, %v1331_v10, %v1327_v13  ;;  %1767 = vrcp.f32 %v1151_v11  ;;  %v1065_v16 = vpop.f32.mrf.mxu1  ;;  %vm1341_vm7 = vmor %vm1339_vm6, %vm1340_vm5  ;;  %v1360_v31 = vand.u32 2147483648, %v1151_v11  ;;  %v1358_v34 = vand.u32 2147483647, %v1151_v11 }
 0x2b5   : > { %1406 = vst.msk [vmem:[%s2082_s15 + $0x58] sm:$0xff] %vm1394_vm4, %v1332_v15  ;;  %v1336_v17 = vsub.f32 1.0, %v1335_v14  ;;  %v1088_v18 = vadd.f32 %v2071_v12, %v1065_v16  ;;  %vm1354_vm10 = vweird.f32 %v1151_v11 }
 0x2b6   : > { %v1361_v38 = vor.u32 1.1754944e-38, %v1360_v31  ;;  %vm1359_vm12 = vcmp.eq.f32.partialorder %v1358_v34, 8.507059e+37 }
 0x2b7   : > { %v1337_v20 = vmul.f32 %v1766_v9, %v1336_v17  ;;  %v1650_v22 = vmul.f32 -1.442695, %v1088_v18 }
 0x2b9   : > { %v1338_v23 = vadd.f32 %v1766_v9, %v1337_v20  ;;  %1769 = vpow2.f32 %v1650_v22 }
 0x2ba   : > { %v1768_v24 = vpop.eup %1767 }
 0x2bb   : > { %v1342_v26 = vsel %vm1341_vm7, %v1766_v9, %v1338_v23  ;;  %v1350_v49 = vmul.f32 %v1768_v24, %v1151_v11  ;;  %vm1355_vm9 = vweird.f32 %v1768_v24 }
 0x2bc   : > { %v1347_v27 = vsel %vm1344_vm8, %v1346_v25, %v1342_v26  ;;  %v1067_v28 = vpop.f32.mrf.mxu1  ;;  %vm1356_vm11 = vmor %vm1354_vm10, %vm1355_vm9 }
 0x2bd   : > { %1407 = vst.msk [vmem:[%s2082_s15 + $0x60] sm:$0xff] %vm1394_vm4, %v1347_v27  ;;  %v1351_v29 = vsub.f32 1.0, %v1350_v49  ;;  %v1089_v30 = vadd.f32 %v2071_v12, %v1067_v28 }
 0x2bf   : > { %v1770_v32 = vpop.eup %1769  ;;  %v1352_v33 = vmul.f32 %v1768_v24, %v1351_v29  ;;  %v1651_v35 = vmul.f32 -1.442695, %v1089_v30 }
 0x2c0   : > { %v1152_v36 = vadd.f32 1.0, %v1770_v32 }
 0x2c1   : > { %v1353_v37 = vadd.f32 %v1768_v24, %v1352_v33  ;;  %1771 = vpow2.f32 %v1651_v35 }
 0x2c2   : > { %1773 = vrcp.f32 %v1152_v36  ;;  %v1375_v45 = vand.u32 2147483648, %v1152_v36  ;;  %v1373_v47 = vand.u32 2147483647, %v1152_v36  ;;  %vm1369_vm14 = vweird.f32 %v1152_v36 }
 0x2c3   : > { %v1357_v39 = vsel %vm1356_vm11, %v1768_v24, %v1353_v37 }
 0x2c4   : > { %v1362_v40 = vsel %vm1359_vm12, %v1361_v38, %v1357_v39  ;;  %v1376_v56 = vor.u32 1.1754944e-38, %v1375_v45  ;;  %vm1374_vm0 = vcmp.eq.f32.partialorder %v1373_v47, 8.507059e+37 }
 0x2c5   : > { %1408 = vst.msk [vmem:[%s2082_s15 + $0x68] sm:$0xff] %vm1394_vm4, %v1362_v40 }
 0x2c7   : > { %v1772_v12 = vpop.eup %1771 }
 0x2c8   : > { %v1774_v41 = vpop.eup %1773  ;;  %v1153_v42 = vadd.f32 1.0, %v1772_v12 }
 0x2c9   : > { %v1365_v43 = vmul.f32 %v1774_v41, %v1152_v36  ;;  %vm1370_vm13 = vweird.f32 %v1774_v41 }
 0x2ca   : > { %1775 = vrcp.f32 %v1153_v42  ;;  %vm1371_vm15 = vmor %vm1369_vm14, %vm1370_vm13  ;;  %v1390_v54 = vand.u32 2147483648, %v1153_v42  ;;  %v1388_v58 = vand.u32 2147483647, %v1153_v42  ;;  %vm1384_vm2 = vweird.f32 %v1153_v42 }
 0x2cb   : > { %v1366_v44 = vsub.f32 1.0, %v1365_v43 }
 0x2cc   : > { %v1391_v60 = vor.u32 1.1754944e-38, %v1390_v54  ;;  %vm1389_vm5 = vcmp.eq.f32.partialorder %v1388_v58, 8.507059e+37 }
 0x2cd   : > { %v1367_v46 = vmul.f32 %v1774_v41, %v1366_v44 }
 0x2cf   : > { %v1368_v48 = vadd.f32 %v1774_v41, %v1367_v46 }
 0x2d0   : > { %v1776_v55 = vpop.eup %1775 }
 0x2d1   : > { %v1372_v50 = vsel %vm1371_vm15, %v1774_v41, %v1368_v48  ;;  %v1380_v51 = vmul.f32 %v1776_v55, %v1153_v42  ;;  %vm1385_vm1 = vweird.f32 %v1776_v55 }
 0x2d2   : > { %v1377_v52 = vsel %vm1374_vm0, %v1376_v56, %v1372_v50  ;;  %vm1386_vm3 = vmor %vm1384_vm2, %vm1385_vm1 }
 0x2d3   : > { %1409 = vst.msk [vmem:[%s2082_s15 + $0x70] sm:$0xff] %vm1394_vm4, %v1377_v52  ;;  %v1381_v53 = vsub.f32 1.0, %v1380_v51 }
 0x2d5   : > { %v1382_v57 = vmul.f32 %v1776_v55, %v1381_v53 }
 0x2d7   : > { %v1383_v59 = vadd.f32 %v1776_v55, %v1382_v57 }
 0x2d9   : > { %v1387_v61 = vsel %vm1386_vm3, %v1776_v55, %v1383_v59 }
 0x2da   : > { %v1392_v62 = vsel %vm1389_vm5, %v1391_v60, %v1387_v61 }
 0x2db   : > { %1410 = vst.msk [vmem:[%s2082_s15 + $0x78] sm:$0xff] %vm1394_vm4, %v1392_v62 }
 0x2dc PF: > { %s19_s30 = sadd.s32 1, %s1783_s30  }
 0x2dd   : > { %p16_p4 = scmp.ge.s32.totalorder %s19_s30, 4  }
 0x2df   :  { %18 = sbr.rel (!%p16_p4) target bundleno = 1 (0x1), region = 86 }

</bundles_post_ra>
